<compile_context>
chip_gen: v7x
topology: tpu7x:2x2x1
jax: 0.10.0
libtpu: 0.0.40
codegen_flags: <defaults>
</compile_context>

<pallas_src>
import jax
import jax.numpy as jnp
from jax.experimental import pallas as pl
from jax.experimental.pallas import tpu as pltpu

LN_EPS = 1e-5  # PyTorch nn.LayerNorm default


def node_order_mlp_kernel(s_ref, e_ref, x1_ref, x2_ref,
                          w1_ref, b1_ref, g_ref, beta_ref,
                          w2_ref, b2_ref, w3_ref, b3_ref,
                          out_ref):
    # --- Linear(4E -> H): in-VMEM concat (lane-dense [TILE_B, 4E]) + a single
    # bf16 MXU matmul with f32 accumulation.  Concat order matches the torch
    # cat order: [start, end, x_1, x_2].  The bf16 cast is free VPU filler.
    a = jnp.concatenate(
        [s_ref[...], e_ref[...], x1_ref[...], x2_ref[...]], axis=-1
    ).astype(jnp.bfloat16)
    h = jnp.dot(a, w1_ref[...], preferred_element_type=jnp.float32)
    h = jnp.maximum(h + b1_ref[...], 0.0)                        # +bias, ReLU

    # --- LayerNorm(H), affine; one-pass f32 statistics ------------------------
    mu = jnp.mean(h, axis=-1, keepdims=True)
    ms = jnp.mean(h * h, axis=-1, keepdims=True)
    var = jnp.maximum(ms - mu * mu, 0.0)          # biased var (PyTorch), >= 0
    h = (h - mu) * jax.lax.rsqrt(var + LN_EPS)
    h = h * g_ref[...] + beta_ref[...]

    # Dropout(p=0.1): identity in eval/inference mode.
    # TODO(synk): training-mode dropout (pltpu.prng_random_bits mask) not implemented.

    # --- Linear(H -> H) + ReLU (bf16 MXU operands, f32 accumulation) ----------
    h2 = jnp.dot(h.astype(w2_ref.dtype), w2_ref[...],
                 preferred_element_type=jnp.float32)
    h2 = jnp.maximum(h2 + b2_ref[...], 0.0)

    # --- Head Linear(H -> 1) on the VPU/XLU: multiply + lane reduction --------
    out = jnp.sum(h2 * w3_ref[...], axis=-1, keepdims=True) + b3_ref[...]
    out_ref[...] = out.astype(out_ref.dtype)


def _choose_tile_b(B):
    """Large power-of-two batch tile, capped so the grid has >= 2 steps
    (v7x megacore sharding of the 'parallel' batch axis) whenever B >= 16."""
    if B <= 8:
        return B
    tile = 8
    for t in (8192, 4096, 2048, 1024, 512, 256, 128, 64, 32, 16, 8):
        if t <= B:
            tile = t
            break
    if B >= 16:
        half = max(8, (((B + 1) // 2) + 7) // 8 * 8)   # multiple of 8 sublanes
        tile = min(tile, half)
    return tile


def node_order_prediction_mlp(x_1, x_2, start_node_embed, end_node_embed, params):
    # Glue (matches torch: squeeze(1); the concat happens inside the kernel).
    s = jnp.squeeze(start_node_embed, axis=1)
    e = jnp.squeeze(end_node_embed, axis=1)
    B, E = s.shape
    H = params["w2"].shape[0]

    # Resident parameters.  W1/W2 cast to bf16 once (weights are tiny);
    # biases / LN affine / head weight stay f32.
    w1 = params["w1"].astype(jnp.bfloat16)    # [4E, H], rows ordered [s, e, x1, x2]
    w2 = params["w2"].astype(jnp.bfloat16)    # [H, H]
    b1, gamma, beta, b2 = params["b1"], params["gamma"], params["beta"], params["b2"]
    w3_row = params["w3"].T                   # [1, H] lane-dense, f32
    b3 = params["b3"]                         # [1, 1]

    TILE_B = _choose_tile_b(B)
    grid = (pl.cdiv(B, TILE_B),)   # ragged last block: OOB output rows are masked

    act_spec = pl.BlockSpec((TILE_B, E), lambda i: (i, 0))
    res = lambda shape: pl.BlockSpec(shape, lambda i: (0, 0))   # VMEM-resident
    out_spec = pl.BlockSpec((TILE_B, 1), lambda i: (i, 0))

    # VMEM budget: double-buffered f32 activation tiles + resident weights +
    # bf16 concat + f32 intermediates; TILE_B=8192 still fits v7x's 64 MiB.
    in_tile_bytes = 4 * TILE_B * E * 4 + TILE_B * 4
    weight_bytes = (4 * E * H + H * H) * 2 + (5 * H + 1) * 4
    scratch_bytes = TILE_B * 4 * E * 2 + 2 * TILE_B * H * 4
    need = 2 * in_tile_bytes + 2 * weight_bytes + scratch_bytes
    vmem_limit = int(min(max(2 * need, 32 * 1024 * 1024), 56 * 1024 * 1024))

    flops = 2 * B * (4 * E * H + H * H + H)
    bytes_accessed = 4 * B * E * 4 + weight_bytes + B * 4

    return pl.pallas_call(
        node_order_mlp_kernel,
        out_shape=jax.ShapeDtypeStruct((B, 1), jnp.float32),
        grid=grid,
        in_specs=[act_spec, act_spec, act_spec, act_spec,
                  res((4 * E, H)), res((1, H)), res((1, H)), res((1, H)),
                  res((H, H)), res((1, H)), res((1, H)), res((1, 1))],
        out_specs=out_spec,
        compiler_params=pltpu.CompilerParams(
            dimension_semantics=("parallel",),
            vmem_limit_bytes=vmem_limit),
        cost_estimate=pl.CostEstimate(
            flops=flops, transcendentals=0, bytes_accessed=bytes_accessed),
    )(s, e, x_1, x_2, w1, b1, gamma, beta, w2, b2, w3_row, b3)


def node_order_prediction_mlp_ref(x_1, x_2, start_node_embed, end_node_embed, params):
    # Pure-JAX f32 reference (mirrors the torch forward, eval-mode dropout).
    s = jnp.squeeze(start_node_embed, axis=1)
    e = jnp.squeeze(end_node_embed, axis=1)
    nodes = jnp.concatenate([s, e, x_1, x_2], axis=1)
    h = jnp.maximum(nodes @ params["w1"] + params["b1"], 0.0)
    mu = jnp.mean(h, axis=-1, keepdims=True)
    var = jnp.mean((h - mu) ** 2, axis=-1, keepdims=True)
    h = (h - mu) / jnp.sqrt(var + LN_EPS)
    h = h * params["gamma"] + params["beta"]
    h2 = jnp.maximum(h @ params["w2"] + params["b2"], 0.0)
    return h2 @ params["w3"] + params["b3"]


def init_params(key, embed_dim, hidden_dim):
    ks = jax.random.split(key, 3)
    in_dim = embed_dim * 4

    # Deterministic synthetic init (uniform, roughly PyTorch-Linear-like scale).
    def lin(k, fan_in, fan_out):
        bound = 1.0 / jnp.sqrt(fan_in)
        kw, kb = jax.random.split(k)
        w = jax.random.uniform(kw, (fan_in, fan_out), jnp.float32, -bound, bound)
        b = jax.random.uniform(kb, (1, fan_out), jnp.float32, -bound, bound)
        return w, b

    w1, b1 = lin(ks[0], in_dim, hidden_dim)
    w2, b2 = lin(ks[1], hidden_dim, hidden_dim)
    w3, b3 = lin(ks[2], hidden_dim, 1)
    gamma = jnp.ones((1, hidden_dim), jnp.float32)
    beta = jnp.zeros((1, hidden_dim), jnp.float32)
    return {"w1": w1, "b1": b1, "gamma": gamma, "beta": beta,
            "w2": w2, "b2": b2, "w3": w3, "b3": b3}


if __name__ == "__main__":
    key = jax.random.PRNGKey(0)
    B, E, H = 8, 32, 128

    k1, k2, k3, k4, kp = jax.random.split(key, 5)
    x_1 = jax.random.normal(k1, (B, E), jnp.float32)
    x_2 = jax.random.normal(k2, (B, E), jnp.float32)
    start_node_embed = jax.random.normal(k3, (B, 1, E), jnp.float32)
    end_node_embed = jax.random.normal(k4, (B, 1, E), jnp.float32)

    params = init_params(kp, E, H)

    out = node_order_prediction_mlp(x_1, x_2, start_node_embed, end_node_embed, params)
    jax.block_until_ready(out)

    ref = node_order_prediction_mlp_ref(x_1, x_2, start_node_embed, end_node_embed, params)

    assert out.shape == (B, 1)
    assert bool(jnp.all(jnp.isfinite(out)))
    assert bool(jnp.allclose(out, ref, atol=5e-2, rtol=5e-2))
    print("KERNEL_OK")
</pallas_src>

<mosaic_0001>
module attributes {stable_mosaic.version = 11 : i64} {
  func.func @node_order_mlp_kernel(%arg0: i32, %arg1: memref<8x32xf32, #tpu.memory_space<vmem>>, %arg2: memref<8x32xf32, #tpu.memory_space<vmem>>, %arg3: memref<8x32xf32, #tpu.memory_space<vmem>>, %arg4: memref<8x32xf32, #tpu.memory_space<vmem>>, %arg5: memref<128x128xbf16, #tpu.memory_space<vmem>>, %arg6: memref<1x128xf32, #tpu.memory_space<vmem>>, %arg7: memref<1x128xf32, #tpu.memory_space<vmem>>, %arg8: memref<1x128xf32, #tpu.memory_space<vmem>>, %arg9: memref<128x128xbf16, #tpu.memory_space<vmem>>, %arg10: memref<1x128xf32, #tpu.memory_space<vmem>>, %arg11: memref<1x128xf32, #tpu.memory_space<vmem>>, %arg12: memref<1x1xf32, #tpu.memory_space<vmem>>, %arg13: memref<8x1xf32, #tpu.memory_space<vmem>>) attributes {dimension_semantics = [#tpu.dimension_semantics<parallel>], iteration_bounds = array<i64: 1>, scalar_prefetch = 0 : i64, scratch_operands = 0 : i64, tpu.core_type = #tpu.core_type<tc>, window_params = [{transform_indices = @transform_0, window_bounds = array<i64: 8, 32>}, {transform_indices = @transform_1, window_bounds = array<i64: 8, 32>}, {transform_indices = @transform_2, window_bounds = array<i64: 8, 32>}, {transform_indices = @transform_3, window_bounds = array<i64: 8, 32>}, {pipeline_mode = #tpu.pipeline_mode<synchronous>, transform_indices = @transform_4, window_bounds = array<i64: 128, 128>}, {pipeline_mode = #tpu.pipeline_mode<synchronous>, transform_indices = @transform_5, window_bounds = array<i64: 1, 128>}, {pipeline_mode = #tpu.pipeline_mode<synchronous>, transform_indices = @transform_6, window_bounds = array<i64: 1, 128>}, {pipeline_mode = #tpu.pipeline_mode<synchronous>, transform_indices = @transform_7, window_bounds = array<i64: 1, 128>}, {pipeline_mode = #tpu.pipeline_mode<synchronous>, transform_indices = @transform_8, window_bounds = array<i64: 128, 128>}, {pipeline_mode = #tpu.pipeline_mode<synchronous>, transform_indices = @transform_9, window_bounds = array<i64: 1, 128>}, {pipeline_mode = #tpu.pipeline_mode<synchronous>, transform_indices = @transform_10, window_bounds = array<i64: 1, 128>}, {pipeline_mode = #tpu.pipeline_mode<synchronous>, transform_indices = @transform_11, window_bounds = array<i64: 1, 1>}, {transform_indices = @transform_12, window_bounds = array<i64: 8, 1>}]} {
    %c0 = arith.constant 0 : index
    %c0_0 = arith.constant 0 : index
    %0 = vector.load %arg1[%c0, %c0_0] : memref<8x32xf32, #tpu.memory_space<vmem>>, vector<8x32xf32>
    %c0_1 = arith.constant 0 : index
    %c0_2 = arith.constant 0 : index
    %1 = vector.load %arg2[%c0_1, %c0_2] : memref<8x32xf32, #tpu.memory_space<vmem>>, vector<8x32xf32>
    %c0_3 = arith.constant 0 : index
    %c0_4 = arith.constant 0 : index
    %2 = vector.load %arg3[%c0_3, %c0_4] : memref<8x32xf32, #tpu.memory_space<vmem>>, vector<8x32xf32>
    %c0_5 = arith.constant 0 : index
    %c0_6 = arith.constant 0 : index
    %3 = vector.load %arg4[%c0_5, %c0_6] : memref<8x32xf32, #tpu.memory_space<vmem>>, vector<8x32xf32>
    %4 = tpu.concatenate %0, %1, %2, %3 in 1 : vector<8x32xf32>, vector<8x32xf32>, vector<8x32xf32>, vector<8x32xf32> -> vector<8x128xf32>
    %5 = arith.truncf %4 : vector<8x128xf32> to vector<8x128xbf16>
    %c0_7 = arith.constant 0 : index
    %c0_8 = arith.constant 0 : index
    %6 = vector.load %arg5[%c0_7, %c0_8] : memref<128x128xbf16, #tpu.memory_space<vmem>>, vector<128x128xbf16>
    %cst = arith.constant dense<0.000000e+00> : vector<8x128xf32>
    %7 = tpu.matmul %5, %6, %cst {dimension_numbers = #tpu.dot_dimension_numbers<[1], [0], [0], [1], [0, 0, 1, 1], [], []>} : vector<8x128xbf16>, vector<128x128xbf16>, vector<8x128xf32> -> vector<8x128xf32>
    %c0_9 = arith.constant 0 : index
    %c0_10 = arith.constant 0 : index
    %8 = vector.load %arg6[%c0_9, %c0_10] : memref<1x128xf32, #tpu.memory_space<vmem>>, vector<1x128xf32>
    %9 = vector.broadcast %8 : vector<1x128xf32> to vector<8x128xf32>
    %10 = arith.addf %7, %9 : vector<8x128xf32>
    %cst_11 = arith.constant 0.000000e+00 : f32
    %11 = vector.broadcast %cst_11 : f32 to vector<8x128xf32>
    %12 = arith.maximumf %10, %11 : vector<8x128xf32>
    %cst_12 = arith.constant dense<0.000000e+00> : vector<8xf32>
    %13 = vector.multi_reduction <add>, %12, %cst_12 [1] : vector<8x128xf32> to vector<8xf32>
    %14 = vector.shape_cast %13 : vector<8xf32> to vector<8x1xf32>
    %cst_13 = arith.constant 1.280000e+02 : f32
    %15 = vector.broadcast %cst_13 : f32 to vector<8x1xf32>
    %16 = arith.divf %14, %15 : vector<8x1xf32>
    %17 = arith.mulf %12, %12 : vector<8x128xf32>
    %cst_14 = arith.constant dense<0.000000e+00> : vector<8xf32>
    %18 = vector.multi_reduction <add>, %17, %cst_14 [1] : vector<8x128xf32> to vector<8xf32>
    %19 = vector.shape_cast %18 : vector<8xf32> to vector<8x1xf32>
    %cst_15 = arith.constant 1.280000e+02 : f32
    %20 = vector.broadcast %cst_15 : f32 to vector<8x1xf32>
    %21 = arith.divf %19, %20 : vector<8x1xf32>
    %22 = arith.mulf %16, %16 : vector<8x1xf32>
    %23 = arith.subf %21, %22 : vector<8x1xf32>
    %cst_16 = arith.constant 0.000000e+00 : f32
    %24 = vector.broadcast %cst_16 : f32 to vector<8x1xf32>
    %25 = arith.maximumf %23, %24 : vector<8x1xf32>
    %26 = vector.broadcast %16 : vector<8x1xf32> to vector<8x128xf32>
    %27 = arith.subf %12, %26 : vector<8x128xf32>
    %cst_17 = arith.constant 9.99999974E-6 : f32
    %28 = vector.broadcast %cst_17 : f32 to vector<8x1xf32>
    %29 = arith.addf %25, %28 : vector<8x1xf32>
    %30 = math.rsqrt %29 : vector<8x1xf32>
    %31 = vector.broadcast %30 : vector<8x1xf32> to vector<8x128xf32>
    %32 = arith.mulf %27, %31 : vector<8x128xf32>
    %c0_18 = arith.constant 0 : index
    %c0_19 = arith.constant 0 : index
    %33 = vector.load %arg7[%c0_18, %c0_19] : memref<1x128xf32, #tpu.memory_space<vmem>>, vector<1x128xf32>
    %34 = vector.broadcast %33 : vector<1x128xf32> to vector<8x128xf32>
    %35 = arith.mulf %32, %34 : vector<8x128xf32>
    %c0_20 = arith.constant 0 : index
    %c0_21 = arith.constant 0 : index
    %36 = vector.load %arg8[%c0_20, %c0_21] : memref<1x128xf32, #tpu.memory_space<vmem>>, vector<1x128xf32>
    %37 = vector.broadcast %36 : vector<1x128xf32> to vector<8x128xf32>
    %38 = arith.addf %35, %37 : vector<8x128xf32>
    %39 = arith.truncf %38 : vector<8x128xf32> to vector<8x128xbf16>
    %c0_22 = arith.constant 0 : index
    %c0_23 = arith.constant 0 : index
    %40 = vector.load %arg9[%c0_22, %c0_23] : memref<128x128xbf16, #tpu.memory_space<vmem>>, vector<128x128xbf16>
    %cst_24 = arith.constant dense<0.000000e+00> : vector<8x128xf32>
    %41 = tpu.matmul %39, %40, %cst_24 {dimension_numbers = #tpu.dot_dimension_numbers<[1], [0], [0], [1], [0, 0, 1, 1], [], []>} : vector<8x128xbf16>, vector<128x128xbf16>, vector<8x128xf32> -> vector<8x128xf32>
    %c0_25 = arith.constant 0 : index
    %c0_26 = arith.constant 0 : index
    %42 = vector.load %arg10[%c0_25, %c0_26] : memref<1x128xf32, #tpu.memory_space<vmem>>, vector<1x128xf32>
    %43 = vector.broadcast %42 : vector<1x128xf32> to vector<8x128xf32>
    %44 = arith.addf %41, %43 : vector<8x128xf32>
    %cst_27 = arith.constant 0.000000e+00 : f32
    %45 = vector.broadcast %cst_27 : f32 to vector<8x128xf32>
    %46 = arith.maximumf %44, %45 : vector<8x128xf32>
    %c0_28 = arith.constant 0 : index
    %c0_29 = arith.constant 0 : index
    %47 = vector.load %arg11[%c0_28, %c0_29] : memref<1x128xf32, #tpu.memory_space<vmem>>, vector<1x128xf32>
    %48 = vector.broadcast %47 : vector<1x128xf32> to vector<8x128xf32>
    %49 = arith.mulf %46, %48 : vector<8x128xf32>
    %cst_30 = arith.constant dense<0.000000e+00> : vector<8xf32>
    %50 = vector.multi_reduction <add>, %49, %cst_30 [1] : vector<8x128xf32> to vector<8xf32>
    %51 = vector.shape_cast %50 : vector<8xf32> to vector<8x1xf32>
    %c0_31 = arith.constant 0 : index
    %c0_32 = arith.constant 0 : index
    %52 = vector.load %arg12[%c0_31, %c0_32] : memref<1x1xf32, #tpu.memory_space<vmem>>, vector<1x1xf32>
    %53 = vector.broadcast %52 : vector<1x1xf32> to vector<8x1xf32>
    %54 = arith.addf %51, %53 : vector<8x1xf32>
    %c0_33 = arith.constant 0 : index
    %c0_34 = arith.constant 0 : index
    %55 = vector.load %arg13[%c0_33, %c0_34] : memref<8x1xf32, #tpu.memory_space<vmem>>, vector<8x1xf32>
    tpu.vector_store %arg13[%c0_33, %c0_34], %54 {strides = array<i32>} : memref<8x1xf32, #tpu.memory_space<vmem>>, vector<8x1xf32>,
    return
  }
  func.func @transform_0(%arg0: i32) -> (i32, i32) {
    %c0_i32 = arith.constant 0 : i32
    %c0_i32_0 = arith.constant 0 : i32
    return %arg0, %c0_i32 : i32, i32
  }
  func.func @transform_1(%arg0: i32) -> (i32, i32) {
    %c0_i32 = arith.constant 0 : i32
    %c0_i32_0 = arith.constant 0 : i32
    return %arg0, %c0_i32 : i32, i32
  }
  func.func @transform_2(%arg0: i32) -> (i32, i32) {
    %c0_i32 = arith.constant 0 : i32
    %c0_i32_0 = arith.constant 0 : i32
    return %arg0, %c0_i32 : i32, i32
  }
  func.func @transform_3(%arg0: i32) -> (i32, i32) {
    %c0_i32 = arith.constant 0 : i32
    %c0_i32_0 = arith.constant 0 : i32
    return %arg0, %c0_i32 : i32, i32
  }
  func.func @transform_4(%arg0: i32) -> (i32, i32) {
    %c0_i32 = arith.constant 0 : i32
    %c0_i32_0 = arith.constant 0 : i32
    %c0_i32_1 = arith.constant 0 : i32
    return %c0_i32, %c0_i32_0 : i32, i32
  }
  func.func @transform_5(%arg0: i32) -> (i32, i32) {
    %c0_i32 = arith.constant 0 : i32
    %c0_i32_0 = arith.constant 0 : i32
    %c0_i32_1 = arith.constant 0 : i32
    return %c0_i32, %c0_i32_0 : i32, i32
  }
  func.func @transform_6(%arg0: i32) -> (i32, i32) {
    %c0_i32 = arith.constant 0 : i32
    %c0_i32_0 = arith.constant 0 : i32
    %c0_i32_1 = arith.constant 0 : i32
    return %c0_i32, %c0_i32_0 : i32, i32
  }
  func.func @transform_7(%arg0: i32) -> (i32, i32) {
    %c0_i32 = arith.constant 0 : i32
    %c0_i32_0 = arith.constant 0 : i32
    %c0_i32_1 = arith.constant 0 : i32
    return %c0_i32, %c0_i32_0 : i32, i32
  }
  func.func @transform_8(%arg0: i32) -> (i32, i32) {
    %c0_i32 = arith.constant 0 : i32
    %c0_i32_0 = arith.constant 0 : i32
    %c0_i32_1 = arith.constant 0 : i32
    return %c0_i32, %c0_i32_0 : i32, i32
  }
  func.func @transform_9(%arg0: i32) -> (i32, i32) {
    %c0_i32 = arith.constant 0 : i32
    %c0_i32_0 = arith.constant 0 : i32
    %c0_i32_1 = arith.constant 0 : i32
    return %c0_i32, %c0_i32_0 : i32, i32
  }
  func.func @transform_10(%arg0: i32) -> (i32, i32) {
    %c0_i32 = arith.constant 0 : i32
    %c0_i32_0 = arith.constant 0 : i32
    %c0_i32_1 = arith.constant 0 : i32
    return %c0_i32, %c0_i32_0 : i32, i32
  }
  func.func @transform_11(%arg0: i32) -> (i32, i32) {
    %c0_i32 = arith.constant 0 : i32
    %c0_i32_0 = arith.constant 0 : i32
    %c0_i32_1 = arith.constant 0 : i32
    return %c0_i32, %c0_i32_0 : i32, i32
  }
  func.func @transform_12(%arg0: i32) -> (i32, i32) {
    %c0_i32 = arith.constant 0 : i32
    %c0_i32_0 = arith.constant 0 : i32
    return %arg0, %c0_i32 : i32, i32
  }
}

</mosaic_0001>

<bundles_post_ra>
// kernel: tpu_custom_call.1
= control target key start
LH: loop header
LB: loop body
LE: loop exit
PB: predicated region body
PF: predicated region fallthrough
CT: control target
= control target key end

     0   :  { %s829_s0 = inlined_call_operand.hbm [shape: f32[8,32], index: 0, kind: input, shape index: {}]   ;;  %s830_s1 = inlined_call_operand.hbm [shape: f32[8,32], index: 1, kind: input, shape index: {}]   ;;  %s831_s2 = inlined_call_operand.vmem [shape: f32[8,32], index: 2, kind: input, shape index: {}]   ;;  %s832_s3 = inlined_call_operand.hbm [shape: f32[8,32], index: 3, kind: input, shape index: {}]   ;;  %s833_s4 = inlined_call_operand.hbm [shape: bf16[128,128], index: 4, kind: input, shape index: {}]   ;;  %s834_s5 = inlined_call_operand.vmem [shape: f32[1,128], index: 5, kind: input, shape index: {}]   ;;  %s835_s6 = inlined_call_operand.vmem [shape: f32[1,128], index: 6, kind: input, shape index: {}]   ;;  %s836_s7 = inlined_call_operand.vmem [shape: f32[1,128], index: 7, kind: input, shape index: {}]   ;;  %s837_s8 = inlined_call_operand.hbm [shape: bf16[128,128], index: 8, kind: input, shape index: {}]   ;;  %s838_s9 = inlined_call_operand.vmem [shape: f32[1,128], index: 9, kind: input, shape index: {}]   ;;  %s839_s10 = inlined_call_operand.vmem [shape: f32[1,128], index: 10, kind: input, shape index: {}]   ;;  %s840_s11 = inlined_call_operand.<no memory space> [shape: f32[1,1], index: 11, kind: input, shape index: {}]   ;;  %s841_s12 = inlined_call_operand.vmem [shape: f32[8,1], index: 12, kind: output, shape index: {}]  }
   0x1   :  { %v17_v0 = vstv %s840_s11 }
   0x2   :  { %18 = vst [vmem:[#allocation2] sm:$0x1] %v17_v0 }
   0x3   :  { %19 = vsyncpa [#allocation4], 0 }
   0x4   :  { %20 = vsyncpa [#allocation6], 0 }
   0x5   :  { %21 = vsyncpa [#allocation9], 0  ;;  %s637_s23 = smov [#allocation5]   ;;  %s638_s25 = smov [#allocation8]  }
   0x6   :  { %s38_s24 = sshll.u32 %s637_s23, 4  ;;  %s59_s26 = sshll.u32 %s638_s25, 4  ;;  %s39_s24 = int_to_ptr.vmem [resolvable:$true] %s38_s24  ;;  %s716_s26 = int_to_ptr.vmem [resolvable:$true] %s59_s26 }
   0x7   :  { %s521_s29 = scalar_lea.hbm %s830_s1, 128 }
   0x8   :  { %p522_p0 = scmp.ne.s32.totalorder %s830_s1, %s521_s29  ;;  %p525_p1 = scmp.lt.u32.totalorder %s521_s29, %s830_s1 }
   0xa   :  { %p527_p2 = pnand %p525_p1, %p522_p0 }
   0xc   :  { %530 = shalt.err (!%p527_p2)
}
   0xd   :  { %s531_s15 = scalar_lea.vmem %s39_s24, 128  ;;  %p536_p4 = scmp.lt.s32.totalorder %s39_s24, %s39_s24 }
   0xe   :  { %p532_p3 = scmp.ne.s32.totalorder %s39_s24, %s531_s15  ;;  %p537_p5 = scmp.lt.s32.totalorder %s531_s15, %s531_s15 }
  0x10   :  { %p538_p6 = por %p537_p5, %p536_p4 }
  0x12   :  { %p539_p7 = pnand %p538_p6, %p532_p3 }
  0x14   :  { %542 = shalt.err (!%p539_p7)
}
  0x15   :  { %41 = dma.hbm_to_vmem [thread:$0]  %s830_s1, 128, %s39_s24, [#allocation6]  }
  0x16   :  { %s543_s20 = scalar_lea.hbm %s833_s4, 1024 }
  0x17   :  { %p544_p8 = scmp.ne.s32.totalorder %s833_s4, %s543_s20  ;;  %p547_p9 = scmp.lt.u32.totalorder %s543_s20, %s833_s4 }
  0x19   :  { %p549_p10 = pnand %p547_p9, %p544_p8 }
  0x1b   :  { %552 = shalt.err (!%p549_p10)
}
  0x1c   :  { %s553_s27 = scalar_lea.vmem %s716_s26, 1024  ;;  %p558_p12 = scmp.lt.s32.totalorder %s716_s26, %s716_s26 }
  0x1d   :  { %p554_p11 = scmp.ne.s32.totalorder %s716_s26, %s553_s27  ;;  %p559_p13 = scmp.lt.s32.totalorder %s553_s27, %s553_s27 }
  0x1f   :  { %p560_p0 = por %p559_p13, %p558_p12 }
  0x21   :  { %p561_p1 = pnand %p560_p0, %p554_p11 }
  0x23   :  { %564 = shalt.err (!%p561_p1)
}
  0x24   :  { %s639_s1 = smov 64   ;;  %s640_s24 = smov 4  }
  0x25   :  { %65 = dma.hbm_to_vmem [thread:$0]  %s833_s4, 1024, %s716_s26, [#allocation9], %s639_s1, %s639_s1, %s640_s24  }
  0x26   :  { %s641_s30 = smov [#allocation3]   ;;  %s642_s11 = smov [#allocation7]  }
  0x27   :  { %s28_s13 = sshll.u32 %s641_s30, 4  ;;  %s50_s14 = sshll.u32 %s642_s11, 4  ;;  %s29_s13 = int_to_ptr.vmem [resolvable:$true] %s28_s13  ;;  %s51_s14 = int_to_ptr.vmem [resolvable:$true] %s50_s14 }
  0x28   :  { %s565_s17 = scalar_lea.hbm %s829_s0, 128 }
  0x29   :  { %p566_p2 = scmp.ne.s32.totalorder %s829_s0, %s565_s17  ;;  %p569_p3 = scmp.lt.u32.totalorder %s565_s17, %s829_s0 }
  0x2b   :  { %p571_p4 = pnand %p569_p3, %p566_p2 }
  0x2d   :  { %574 = shalt.err (!%p571_p4)
}
  0x2e   :  { %s575_s4 = scalar_lea.vmem %s29_s13, 128  ;;  %p580_p6 = scmp.lt.s32.totalorder %s29_s13, %s29_s13 }
  0x2f   :  { %p576_p5 = scmp.ne.s32.totalorder %s29_s13, %s575_s4  ;;  %p581_p7 = scmp.lt.s32.totalorder %s575_s4, %s575_s4 }
  0x31   :  { %p582_p8 = por %p581_p7, %p580_p6 }
  0x33   :  { %p583_p9 = pnand %p582_p8, %p576_p5 }
  0x35   :  { %586 = shalt.err (!%p583_p9)
}
  0x36   :  { %31 = dma.hbm_to_vmem [thread:$0]  %s829_s0, 128, %s29_s13, [#allocation4]  }
  0x37   :  { %s587_s27 = scalar_lea.hbm %s832_s3, 128 }
  0x38   :  { %p588_p10 = scmp.ne.s32.totalorder %s832_s3, %s587_s27  ;;  %p591_p11 = scmp.lt.u32.totalorder %s587_s27, %s832_s3 }
  0x3a   :  { %p593_p12 = pnand %p591_p11, %p588_p10 }
  0x3c   :  { %596 = shalt.err (!%p593_p12)
}
  0x3d   :  { %s597_s15 = scalar_lea.vmem %s51_s14, 128  ;;  %p602_p0 = scmp.lt.s32.totalorder %s51_s14, %s51_s14 }
  0x3e   :  { %p598_p13 = scmp.ne.s32.totalorder %s51_s14, %s597_s15  ;;  %p603_p1 = scmp.lt.s32.totalorder %s597_s15, %s597_s15 }
  0x40   :  { %p604_p2 = por %p603_p1, %p602_p0 }
  0x42   :  { %p605_p3 = pnand %p604_p2, %p598_p13 }
  0x44   :  { %608 = shalt.err (!%p605_p3)
}
  0x45   :  { %53 = dma.hbm_to_vmem [thread:$0]  %s832_s3, 128, %s51_s14, [#allocation6]  }
  0x46   :  { %s643_s16 = smov [#allocation10]   ;;  %s609_s20 = scalar_lea.hbm %s837_s8, 1024 }
  0x47   :  { %s77_s17 = sshll.u32 %s643_s16, 4  ;;  %p610_p4 = scmp.ne.s32.totalorder %s837_s8, %s609_s20  ;;  %s78_s17 = int_to_ptr.vmem [resolvable:$true] %s77_s17 }
  0x48   :  { %p613_p5 = scmp.lt.u32.totalorder %s609_s20, %s837_s8 }
  0x4a   :  { %p615_p6 = pnand %p613_p5, %p610_p4 }
  0x4c   :  { %618 = shalt.err (!%p615_p6)
}
  0x4d   :  { %s619_s23 = scalar_lea.vmem %s78_s17, 1024  ;;  %p624_p8 = scmp.lt.s32.totalorder %s78_s17, %s78_s17 }
  0x4e   :  { %p620_p7 = scmp.ne.s32.totalorder %s78_s17, %s619_s23  ;;  %p625_p9 = scmp.lt.s32.totalorder %s619_s23, %s619_s23 }
  0x50   :  { %p626_p10 = por %p625_p9, %p624_p8 }
  0x52   :  { %p627_p11 = pnand %p626_p10, %p620_p7 }
  0x54   :  { %630 = shalt.err (!%p627_p11)
}
  0x55   :  { %83 = dma.hbm_to_vmem [thread:$0]  %s837_s8, 1024, %s78_s17, [#allocation9], %s639_s1, %s639_s1, %s640_s24  }
  0x56   :  { %631 = dma.done.wait [#allocation4], 128  }
  0x57   :  { %632 = vsyncadd [#allocation4], 4294967168 }
  0x58   :  { %633 = dma.done.wait [#allocation6], 256  }
  0x59   :  { %634 = vsyncadd [#allocation6], 4294967040 }
  0x5a   :  { %635 = dma.done.wait [#allocation9], 2048  }
  0x5b   :  { %636 = vsyncadd [#allocation9], 4294965248  ;;  %v644_v1 = vmov 0.0   ;;  %vm645_vm0 = vmmov 0   ;;  %v107_v2 = vld [vmem:[#allocation5] sm:$0xff]  ;;  %v109_v3 = vld [vmem:[#allocation7] sm:$0xff] }
  0x5c   :  { %452 = vmatprep.subr.bf16.mxu0 %v644_v1  ;;  %472 = vmatprep.subr.bf16.mxu1 %v644_v1  ;;  %s646_s25 = smov 32   ;;  %s647_s8 = smov 96   ;;  %v503_v4 = vld [vmem:[#allocation8] sm:$0xff]   ;;  %v504_v6 = vld [vmem:[#allocation8 + $0x8] sm:$0xff]   ;;  %v505_v7 = vld [vmem:[#allocation8 + $0x10] sm:$0xff]   ;;  %vm122_vm1 = vcmask 261120  }
  0x5d   :  { %468 = vmatprep.mubr.msk.bf16.mxu0 %vm645_vm0, %v644_v1  ;;  %488 = vmatprep.mubr.msk.bf16.mxu1 %vm645_vm0, %v644_v1  ;;  %v108_v5 = vld [vmem:[%s831_s2] sm:$0xff]  ;;  %v506_v8 = vld [vmem:[#allocation8 + $0x18] sm:$0xff]   ;;  %v509_v11 = vld [vmem:[#allocation8 + $0x30] sm:$0xff]   ;;  %vm124_vm2 = vcmask 523264   ;;  %vm126_vm3 = vcmask 785408   ;;  %vm403_vm4 = vcmask 7168  }
  0x5e   :  { %111 = vrot.lane.b32.xlu0 %v107_v2, %s646_s25  ;;  %119 = vrot.lane.b32.xlu1 %v109_v3, %s647_s8  ;;  %v507_v9 = vld [vmem:[#allocation8 + $0x20] sm:$0xff]   ;;  %v508_v10 = vld [vmem:[#allocation8 + $0x28] sm:$0xff]   ;;  %v510_v12 = vld [vmem:[#allocation8 + $0x38] sm:$0xff]  }
  0x5f   :  { %453 = vmatpush3.bf16.msra.mxu0 %v503_v4  ;;  %v106_v14 = vld [vmem:[#allocation3] sm:$0xff]  ;;  %v511_v21 = vld [vmem:[#allocation10] sm:$0xff]   ;;  %v513_v31 = vld [vmem:[#allocation10 + $0x10] sm:$0xff]  }
  0x60   :  { %454 = vmatprep.subr.bf16.mxu0 %v644_v1  ;;  %473 = vmatpush3.bf16.msra.mxu1 %v511_v21  ;;  %v412_v22 = vld [vmem:[%s834_s5] ss:$0 sm:$0xff]  ;;  %v512_v30 = vld [vmem:[#allocation10 + $0x8] sm:$0xff]   ;;  %v514_v32 = vld [vmem:[#allocation10 + $0x18] sm:$0xff]  }
  0x61   :  { %474 = vmatprep.subr.bf16.mxu1 %v644_v1  ;;  %v515_v33 = vld [vmem:[#allocation10 + $0x20] sm:$0xff]   ;;  %v516_v34 = vld [vmem:[#allocation10 + $0x28] sm:$0xff]   ;;  %v517_v35 = vld [vmem:[#allocation10 + $0x30] sm:$0xff]  }
  0x62   :  { %115 = vrot.lane.b32.xlu0 %v108_v5, %s639_s1  ;;  %v518_v36 = vld [vmem:[#allocation10 + $0x38] sm:$0xff]   ;;  %v421_v47 = vld [vmem:[%s835_s6] ss:$0 sm:$0xff] }
  0x63   :  { %455 = vmatpush3.bf16.msra.mxu0 %v504_v6  ;;  %v422_v49 = vld [vmem:[%s836_s7] ss:$0 sm:$0xff] }
  0x64   :  { %456 = vmatprep.subr.bf16.mxu0 %v644_v1  ;;  %475 = vmatpush3.bf16.msra.mxu1 %v512_v30  ;;  %v423_v53 = vld [vmem:[%s838_s9] ss:$0 sm:$0xff] }
  0x65   :  { %476 = vmatprep.subr.bf16.mxu1 %v644_v1  ;;  %v432_v58 = vld [vmem:[%s839_s10] ss:$0 sm:$0xff] }
  0x66   :  { %v433_v62 = vld [vmem:[#allocation2] ss:$0 sm:$0xff] }
  0x67   :  { %457 = vmatpush3.bf16.msra.mxu0 %v505_v7 }
  0x68   :  { %458 = vmatprep.subr.bf16.mxu0 %v644_v1  ;;  %477 = vmatpush3.bf16.msra.mxu1 %v513_v31 }
  0x69   :  { %478 = vmatprep.subr.bf16.mxu1 %v644_v1 }
  0x6b   :  { %459 = vmatpush3.bf16.msra.mxu0 %v506_v8 }
  0x6c   :  { %460 = vmatprep.subr.bf16.mxu0 %v644_v1  ;;  %479 = vmatpush3.bf16.msra.mxu1 %v514_v32 }
  0x6d   :  { %480 = vmatprep.subr.bf16.mxu1 %v644_v1 }
  0x6f   :  { %461 = vmatpush3.bf16.msra.mxu0 %v507_v9 }
  0x70   :  { %462 = vmatprep.subr.bf16.mxu0 %v644_v1  ;;  %481 = vmatpush3.bf16.msra.mxu1 %v515_v33 }
  0x71   :  { %482 = vmatprep.subr.bf16.mxu1 %v644_v1 }
  0x73   :  { %463 = vmatpush3.bf16.msra.mxu0 %v508_v10 }
  0x74   :  { %464 = vmatprep.subr.bf16.mxu0 %v644_v1  ;;  %483 = vmatpush3.bf16.msra.mxu1 %v516_v34 }
  0x75   :  { %484 = vmatprep.subr.bf16.mxu1 %v644_v1 }
  0x77   :  { %465 = vmatpush3.bf16.msra.mxu0 %v509_v11 }
  0x78   :  { %466 = vmatprep.subr.bf16.mxu0 %v644_v1  ;;  %485 = vmatpush3.bf16.msra.mxu1 %v517_v35 }
  0x79   :  { %486 = vmatprep.subr.bf16.mxu1 %v644_v1 }
  0x7b   :  { %467 = vmatpush3.bf16.msra.mxu0 %v510_v12 }
  0x7c   :  { %487 = vmatpush3.bf16.msra.mxu1 %v518_v36 }
  0xd0   :  { %v112_v13 = vpop.permute.xlu0 %111  ;;  %v120_v15 = vpop.permute.xlu1 %119 }
  0xd1   :  { %v123_v16 = vsel %vm122_vm1, %v106_v14, %v112_v13 }
  0xd4   :  { %v116_v17 = vpop.permute.xlu0 %115 }
  0xd5   :  { %v125_v18 = vsel %vm124_vm2, %v123_v16, %v116_v17 }
  0xd6   :  { %v127_v19 = vsel %vm126_vm3, %v125_v18, %v120_v15 }
  0xd7   :  { %v128_v20 = vpack.c.bf16 %v127_v19, %v127_v19 }
  0xd9   :  { %469 = vmatmul.mubr.bf16.vlgmr.msra.gmra.mrb[0].mxu0 %v128_v20 }
 0x1ac   :  { %v234_v23 = vpop.f32.mrb[0].mxu0 }
 0x1ad   :  { %v235_v24 = vadd.f32 %v412_v22, %v234_v23  ;;  %v470_v25 = vpop.f32.mrb[1].mxu0 }
 0x1ae   :  { %v237_v26 = vpop.f32.mrb[2].mxu0 }
 0x1af   :  { %v240_v27 = vmax.f32 %v235_v24, 0.0  ;;  %v471_v28 = vpop.f32.mrb[3].mxu0 }
 0x1b1   :  { %241 = vadd.xlane.f32.xlu1 %v240_v27  ;;  %v245_v29 = vmul.f32 %v240_v27, %v240_v27 }
 0x1b3   :  { %246 = vadd.xlane.f32.xlu0 %v245_v29 }
 0x23e   :  { %v242_v37 = vpop.xlane.xlu1 %241 }
 0x23f   :  { %v244_v38 = vmul.f32 0.0078125, %v242_v37 }
 0x240   :  { %v247_v39 = vpop.xlane.xlu0 %246 }
 0x241   :  { %v249_v40 = vmul.f32 %v244_v38, %v244_v38  ;;  %v248_v41 = vmul.f32 0.0078125, %v247_v39  ;;  %v252_v45 = vsub.f32 %v240_v27, %v244_v38 }
 0x243   :  { %v250_v42 = vsub.f32 %v248_v41, %v249_v40 }
 0x245   :  { %v251_v43 = vmax.f32 %v250_v42, 0.0 }
 0x247   :  { %v253_v44 = vadd.f32 1e-05, %v251_v43 }
 0x249   :  { %519 = vrsqrt.f32 %v253_v44 }
 0x253   :  { %v520_v46 = vpop.eup %519 }
 0x254   :  { %v255_v48 = vmul.f32 %v520_v46, %v252_v45 }
 0x256   :  { %v263_v50 = vmul.f32 %v421_v47, %v255_v48 }
 0x258   :  { %v271_v51 = vadd.f32 %v422_v49, %v263_v50 }
 0x25a   :  { %v272_v52 = vpack.c.bf16 %v271_v51, %v271_v51 }
 0x25c   :  { %489 = vmatmul.mubr.bf16.vlgmr.msra.gmra.mrb[0].mxu1 %v272_v52 }
 0x32f   :  { %v378_v54 = vpop.f32.mrb[0].mxu1 }
 0x330   :  { %v379_v55 = vadd.f32 %v423_v53, %v378_v54  ;;  %v490_v56 = vpop.f32.mrb[1].mxu1 }
 0x331   :  { %v381_v57 = vpop.f32.mrb[2].mxu1 }
 0x332   :  { %v384_v59 = vmax.f32 %v379_v55, 0.0  ;;  %v491_v60 = vpop.f32.mrb[3].mxu1 }
 0x334   :  { %v392_v61 = vmul.f32 %v432_v58, %v384_v59 }
 0x336   :  { %393 = vadd.xlane.f32.xlu0 %v392_v61 }
 0x3c3   :  { %v394_v63 = vpop.xlane.xlu0 %393 }
 0x3c4   :  { %v402_v0 = vadd.f32 %v433_v62, %v394_v63 }
 0x3c6   :  { %404 = vst.msk [vmem:[%s841_s12] sm:$0xff] %vm403_vm4, %v402_v0 }
 0x3c7   :  { %409 = vsyncpa [#allocation4], 1 }
 0x3c8   :  { %410 = vsyncpa [#allocation6], 1 }
 0x3c9   :  { %411 = vsyncpa [#allocation9], 1 }

</bundles_post_ra>
